<compile_context>
chip_gen: v6e
topology: v6e:2x2x1
jax: 0.10.0
libtpu: 0.0.40
codegen_flags: <defaults>
</compile_context>

<pallas_src>
import jax
import jax.numpy as jnp
from jax.experimental import pallas as pl
from jax.experimental.pallas import tpu as pltpu


def _round_up(x: int, m: int) -> int:
    return (x + m - 1) // m * m


def _tpu_config():
    """Returns (is_multi_core_chip, k_align, usable_vmem_bytes)."""
    kind = ""
    try:
        dev = jax.devices()[0]
        if dev.platform == "tpu":
            kind = dev.device_kind.lower()
    except Exception:
        pass
    is_v7 = ("v7" in kind) or ("tpu7" in kind)
    is_v6_plus = is_v7 or ("v6" in kind)
    # MXU contraction depth: 256-wide systolic array on v6e/v7x, 128 before.
    k_align = 256 if is_v6_plus else 128
    # Physical VMEM per TensorCore (fallback values if the query fails).
    vmem_bytes = (64 << 20) if is_v7 else (128 << 20)
    try:
        vmem_bytes = int(pltpu.get_tpu_info().vmem_capacity_bytes)
    except Exception:
        pass
    # Leave headroom for Mosaic internal scratch / semaphores / pipeline bufs.
    usable_vmem = max(vmem_bytes - (16 << 20), 16 << 20)
    return is_v7, k_align, usable_vmem


def _constant_block_spec(block_shape, index_map):
    """Single-buffered BlockSpec for a block whose index_map is constant
    across the grid (fetched once -> no point double-buffering it).  Falls
    back to the default double-buffered spec if this JAX version does not
    accept pipeline_mode / 1-deep buffering at construction time."""
    try:
        return pl.BlockSpec(block_shape, index_map, pipeline_mode=pl.Buffered(1))
    except (AttributeError, TypeError, ValueError):
        return pl.BlockSpec(block_shape, index_map)


# ---------------------------------------------------------------------------
# Path 1: resident-table one-hot selection (small / medium tables).
# ---------------------------------------------------------------------------
def _onehot_kernel(idx_ref, iota_ref, table_ref, out_ref):
    # idx_ref   : (TILE_N, 1)     int32  index tile
    # iota_ref  : (1, K_pad)      int32  column ids (constant, single-buffered)
    # table_ref : (K_pad, D_pad)  f32    embedding table (constant, resident)
    # out_ref   : (TILE_N, D_pad) f32
    onehot = (iota_ref[...] == idx_ref[...]).astype(table_ref.dtype)
    out_ref[...] = jnp.dot(
        onehot,
        table_ref[...],
        preferred_element_type=jnp.float32,
        precision=jax.lax.Precision.HIGHEST,  # exact f32 row selection
    ).astype(out_ref.dtype)


def _pick_tile_n(n, k_pad, d_pad, itemsize, vmem_budget, is_multi_core):
    """Row-tile size: big tiles amortize the ~0.35us per-grid-step overhead,
    bounded by usable VMEM; on multi-TC chips keep >=2 grid steps so the
    'parallel' axis can be sharded across TensorCores."""

    def fits(t):
        need = (
            k_pad * d_pad * itemsize        # resident table (single buffer)
            + k_pad * 4                     # constant column-id row
            + 2 * t * 4                     # idx tiles (double buffer)
            + 2 * t * d_pad * itemsize      # out tiles (double buffer)
            + t * k_pad * 4                 # one-hot intermediate
            + (2 << 20)                     # headroom
        )
        return need <= vmem_budget

    tile = 1024 if n >= 8192 else 512
    tile = min(tile, _round_up(max(n, 1), 8))
    while tile > 8 and not fits(tile):
        tile = max(8, _round_up(tile // 2, 8))
    if is_multi_core:
        while tile > 8 and _round_up(n, tile) // tile < 2:
            tile = max(8, _round_up(tile // 2, 8))
    return tile


def _onehot_path(idx_flat, table_pd, num_users, d_pad, *, tile_n, k_align,
                 vmem_budget, is_multi_core):
    n = idx_flat.shape[0]
    itemsize = jnp.dtype(table_pd.dtype).itemsize

    # Pad the contraction dim so the one-hot is lane-dense and the MXU depth
    # is full (256 on v6e/v7x, 128 on v5e).  Padded rows are zero and valid
    # indices never select them, so the result is exact.
    k_pad = _round_up(num_users, k_align)
    table_pk = jnp.pad(table_pd, ((0, k_pad - num_users), (0, 0)))

    if tile_n is None:
        tile_n = _pick_tile_n(n, k_pad, d_pad, itemsize, vmem_budget,
                              is_multi_core)
    n_pad = _round_up(n, tile_n)
    # Padded rows reuse index 0; the caller slices them off.
    idx_p = jnp.pad(idx_flat, (0, n_pad - n)).reshape(n_pad, 1)
    iota_row = jnp.arange(k_pad, dtype=jnp.int32).reshape(1, k_pad)

    est_vmem = (
        k_pad * d_pad * itemsize            # resident table (single-buffered)
        + k_pad * 4                         # column-id row (single-buffered)
        + 2 * tile_n * 4                    # idx tiles (double-buffered)
        + 2 * tile_n * d_pad * itemsize     # out tiles (double-buffered)
        + tile_n * k_pad * 4                # one-hot intermediate
        + (2 << 20)                         # headroom
    )
    vmem_limit = min(max(est_vmem, 16 << 20), vmem_budget)

    grid = (n_pad // tile_n,)
    out = pl.pallas_call(
        _onehot_kernel,
        out_shape=jax.ShapeDtypeStruct((n_pad, d_pad), table_pd.dtype),
        grid_spec=pltpu.PrefetchScalarGridSpec(
            num_scalar_prefetch=0,
            grid=grid,
            in_specs=[
                pl.BlockSpec((tile_n, 1), lambda i: (i, 0)),           # indices
                _constant_block_spec((1, k_pad), lambda i: (0, 0)),    # col ids
                _constant_block_spec((k_pad, d_pad), lambda i: (0, 0)),  # table
            ],
            out_specs=pl.BlockSpec((tile_n, d_pad), lambda i: (i, 0)),
        ),
        compiler_params=pltpu.CompilerParams(
            dimension_semantics=("parallel",),
            vmem_limit_bytes=vmem_limit,
        ),
    )(idx_p, iota_row, table_pk)
    return out[:n]


# ---------------------------------------------------------------------------
# Path 2: scalar-prefetch HBM row gather (large tables).
# ---------------------------------------------------------------------------
def _gather_kernel(idx_sref, row_ref, out_ref):
    # idx_sref : (N,) int32 in SMEM (scalar prefetch; consumed by index_maps)
    # row_ref  : (1, D_pad)  the table row selected by the data-dep BlockSpec
    # out_ref  : (1, D_pad)
    del idx_sref
    out_ref[...] = row_ref[...]


def _gather_path(idx_flat, table_pd, d_pad):
    n = idx_flat.shape[0]
    # TODO(synk): for very large N, batch several gathered rows per grid step
    # with a manual make_async_copy gather (table left in pl.ANY/HBM) to
    # amortize the ~0.35us per-grid-step overhead and widen each DMA.
    return pl.pallas_call(
        _gather_kernel,
        out_shape=jax.ShapeDtypeStruct((n, d_pad), table_pd.dtype),
        grid_spec=pltpu.PrefetchScalarGridSpec(
            num_scalar_prefetch=1,
            grid=(n,),
            in_specs=[
                # Data-dependent row fetch: block height is one row, so the
                # block index along axis 0 is the prefetched user index.
                pl.BlockSpec((1, d_pad), lambda i, idx_ref: (idx_ref[i], 0)),
            ],
            out_specs=pl.BlockSpec((1, d_pad), lambda i, idx_ref: (i, 0)),
        ),
        compiler_params=pltpu.CompilerParams(
            dimension_semantics=("arbitrary",),
        ),
    )(idx_flat, table_pd)


# ---------------------------------------------------------------------------
# Public wrapper (== UserEmbeddings.forward).
# ---------------------------------------------------------------------------
def user_embeddings_forward(user_idx, table, *, mode="auto", tile_n=None):
    """Pallas equivalent of UserEmbeddings.forward(user_idx): table[user_idx].

    user_idx : integer indices, any shape.
    table    : (num_users, embedding_dim) float32 embedding weight.
    mode     : "auto" (size-based), "onehot" (resident table, MXU select), or
               "gather" (scalar-prefetch HBM row gather).
    returns  : (*user_idx.shape, embedding_dim), table.dtype.
    """
    if mode not in ("auto", "onehot", "gather"):
        raise ValueError(f"unknown mode: {mode!r}")

    orig_shape = user_idx.shape
    idx_flat = user_idx.reshape(-1).astype(jnp.int32)
    n = idx_flat.shape[0]
    num_users, d = table.shape
    if n == 0:
        return jnp.zeros((*orig_shape, d), table.dtype)

    is_multi_core, k_align, vmem_budget = _tpu_config()

    # Lane-dense output stores: pad embedding_dim to a multiple of 128.
    d_pad = _round_up(d, 128)
    table_pd = table if d_pad == d else jnp.pad(table, ((0, 0), (0, d_pad - d)))
    itemsize = jnp.dtype(table.dtype).itemsize

    if mode == "auto":
        # Keep the table resident only while it is a small slice of usable
        # VMEM; beyond that the O(N*K*D) one-hot work and the resident-table
        # footprint lose to an HBM-bandwidth-bound gather.
        table_bytes = _round_up(num_users, k_align) * d_pad * itemsize
        mode = "onehot" if table_bytes <= min(8 << 20, vmem_budget // 8) else "gather"

    if mode == "gather":
        # Out-of-range indices are clamped (nn.Embedding would raise instead).
        idx_safe = jnp.clip(idx_flat, 0, num_users - 1)
        out = _gather_path(idx_safe, table_pd, d_pad)
    else:
        # Out-of-range indices select no row and yield zeros on this path.
        out = _onehot_path(idx_flat, table_pd, num_users, d_pad,
                           tile_n=tile_n, k_align=k_align,
                           vmem_budget=vmem_budget,
                           is_multi_core=is_multi_core)

    return out[:, :d].reshape(*orig_shape, d)


if __name__ == "__main__":
    # Module config (small, consistent with UserEmbeddings.__init__).
    num_users = 64
    embedding_dim = 128

    key = jax.random.PRNGKey(0)
    k_table, k_idx = jax.random.split(key)

    # nn.Embedding default init: weight ~ N(0, 1), shape (num_users, dim).
    table = jax.random.normal(k_table, (num_users, embedding_dim),
                              dtype=jnp.float32)
    # user_idx: batch of index sequences, shape (B, S) = (2, 8).
    user_idx = jax.random.randint(k_idx, (2, 8), 0, num_users, dtype=jnp.int32)

    # Reference: plain gather (== torch user_embedding(user_idx)).
    ref = table[user_idx]

    # Small-table path: resident table + exact one-hot MXU selection.
    out_onehot = jax.block_until_ready(
        user_embeddings_forward(user_idx, table, mode="onehot"))
    assert out_onehot.shape == (2, 8, embedding_dim)
    assert jnp.allclose(out_onehot, ref, atol=1e-6), "one-hot path mismatch"

    # Large-table path (exercised here at small shape): scalar-prefetch gather.
    out_gather = jax.block_until_ready(
        user_embeddings_forward(user_idx, table, mode="gather"))
    assert out_gather.shape == (2, 8, embedding_dim)
    assert jnp.array_equal(out_gather, ref), "gather path mismatch"

    # Auto mode (picks the one-hot path for this tiny table).
    out_auto = jax.block_until_ready(user_embeddings_forward(user_idx, table))
    assert jnp.allclose(out_auto, ref, atol=1e-6), "auto path mismatch"

    print("KERNEL_OK")
</pallas_src>

<mosaic_0001>
module attributes {stable_mosaic.version = 11 : i64} {
  func.func @_onehot_kernel(%arg0: i32, %arg1: memref<16x1xi32, #tpu.memory_space<vmem>>, %arg2: memref<1x128xi32, #tpu.memory_space<vmem>>, %arg3: memref<128x128xf32, #tpu.memory_space<vmem>>, %arg4: memref<16x128xf32, #tpu.memory_space<vmem>>) attributes {dimension_semantics = [#tpu.dimension_semantics<parallel>], iteration_bounds = array<i64: 1>, scalar_prefetch = 0 : i64, scratch_operands = 0 : i64, tpu.core_type = #tpu.core_type<tc>, window_params = [{transform_indices = @transform_0, window_bounds = array<i64: 16, 1>}, {pipeline_mode = #tpu.pipeline_mode<synchronous>, transform_indices = @transform_1, window_bounds = array<i64: 1, 128>}, {pipeline_mode = #tpu.pipeline_mode<synchronous>, transform_indices = @transform_2, window_bounds = array<i64: 128, 128>}, {transform_indices = @transform_3, window_bounds = array<i64: 16, 128>}]} {
    %c0 = arith.constant 0 : index
    %c0_0 = arith.constant 0 : index
    %0 = vector.load %arg2[%c0, %c0_0] : memref<1x128xi32, #tpu.memory_space<vmem>>, vector<1x128xi32>
    %c0_1 = arith.constant 0 : index
    %c0_2 = arith.constant 0 : index
    %1 = vector.load %arg1[%c0_1, %c0_2] : memref<16x1xi32, #tpu.memory_space<vmem>>, vector<16x1xi32>
    %2 = vector.broadcast %0 : vector<1x128xi32> to vector<16x128xi32>
    %3 = vector.broadcast %1 : vector<16x1xi32> to vector<16x128xi32>
    %4 = arith.cmpi eq, %2, %3 : vector<16x128xi32>
    %5 = arith.extui %4 : vector<16x128xi1> to vector<16x128xi32>
    %6 = arith.sitofp %5 : vector<16x128xi32> to vector<16x128xf32>
    %c0_3 = arith.constant 0 : index
    %c0_4 = arith.constant 0 : index
    %7 = vector.load %arg3[%c0_3, %c0_4] : memref<128x128xf32, #tpu.memory_space<vmem>>, vector<128x128xf32>
    %cst = arith.constant dense<0.000000e+00> : vector<16x128xf32>
    %8 = tpu.matmul %6, %7, %cst {dimension_numbers = #tpu.dot_dimension_numbers<[1], [0], [0], [1], [0, 0, 1, 1], [], []>, precision = #tpu.contract_precision<fp32>} : vector<16x128xf32>, vector<128x128xf32>, vector<16x128xf32> -> vector<16x128xf32>
    %c0_5 = arith.constant 0 : index
    %c0_6 = arith.constant 0 : index
    %9 = vector.load %arg4[%c0_5, %c0_6] : memref<16x128xf32, #tpu.memory_space<vmem>>, vector<16x128xf32>
    tpu.vector_store %arg4[%c0_5, %c0_6], %8 {strides = array<i32>} : memref<16x128xf32, #tpu.memory_space<vmem>>, vector<16x128xf32>,
    return
  }
  func.func @transform_0(%arg0: i32) -> (i32, i32) {
    %c0_i32 = arith.constant 0 : i32
    %c0_i32_0 = arith.constant 0 : i32
    return %arg0, %c0_i32 : i32, i32
  }
  func.func @transform_1(%arg0: i32) -> (i32, i32) {
    %c0_i32 = arith.constant 0 : i32
    %c0_i32_0 = arith.constant 0 : i32
    %c0_i32_1 = arith.constant 0 : i32
    return %c0_i32, %c0_i32_0 : i32, i32
  }
  func.func @transform_2(%arg0: i32) -> (i32, i32) {
    %c0_i32 = arith.constant 0 : i32
    %c0_i32_0 = arith.constant 0 : i32
    %c0_i32_1 = arith.constant 0 : i32
    return %c0_i32, %c0_i32_0 : i32, i32
  }
  func.func @transform_3(%arg0: i32) -> (i32, i32) {
    %c0_i32 = arith.constant 0 : i32
    %c0_i32_0 = arith.constant 0 : i32
    return %arg0, %c0_i32 : i32, i32
  }
}

</mosaic_0001>

<bundles_post_ra>
// kernel: tpu_custom_call.1
= control target key start
LH: loop header
LB: loop body
LE: loop exit
PB: predicated region body
PF: predicated region fallthrough
CT: control target
= control target key end

     0   :  { %8 = vsyncpa [#allocation3], 0  ;;  %s1559_s0 = inlined_call_operand.vmem [shape: s32[16,1], index: 0, kind: input, shape index: {}]   ;;  %s1560_s1 = inlined_call_operand.vmem [shape: s32[1,128], index: 1, kind: input, shape index: {}]   ;;  %s1561_s2 = inlined_call_operand.hbm [shape: f32[128,128], index: 2, kind: input, shape index: {}]   ;;  %s1562_s3 = inlined_call_operand.hbm [shape: f32[16,128], index: 3, kind: output, shape index: {}]  }
   0x1   :  { %9 = vsyncpa [#allocation4], 0  ;;  %s1146_s12 = smov [#allocation2]  }
   0x2   :  { %s19_s13 = sshll.u32 %s1146_s12, 4  ;;  %s20_s13 = int_to_ptr.vmem [resolvable:$true] %s19_s13 }
   0x3   :  { %s1110_s14 = scalar_lea.vmem %s20_s13, 2048  ;;  %p1115_p1 = scmp.lt.s32.totalorder %s20_s13, %s20_s13 }
   0x4   :  { %p1111_p0 = scmp.ne.s32.totalorder %s20_s13, %s1110_s14  ;;  %p1116_p2 = scmp.lt.s32.totalorder %s1110_s14, %s1110_s14 }
   0x6   :  { %p1117_p3 = por %p1116_p2, %p1115_p1 }
   0x8   :  { %p1118_p4 = pnand %p1117_p3, %p1111_p0 }
   0xa   :  { %1121 = shalt.err (!%p1118_p4)
}
   0xb   :  { %s1147_s15 = smov 128   ;;  %s1148_s16 = smov 8  }
   0xc   :  { %25 = dma.hbm_to_vmem [thread:$0]  %s1561_s2, 2048, %s20_s13, [#allocation3], %s1147_s15, %s1147_s15, %s1148_s16  }
   0xd   :  { %1142 = dma.done.wait [#allocation3], 2048  }
   0xe   :  { %1143 = vsyncadd [#allocation3], 4294965248  ;;  %v1149_v0 = vmov 0   ;;  %v30_v1 = vld [vmem:[%s1559_s0] sm:$0xff]  ;;  %v31_v2 = vld [vmem:[%s1559_s0 + $0x8] sm:$0xff] }
   0xf   :  { %1101 = vset.pattern.permute.xlu0 %v1149_v0  ;;  %v63_v3 = vld [vmem:[#allocation2 + $0x78] sm:$0xff]  ;;  %v62_v5 = vld [vmem:[#allocation2 + $0x70] sm:$0xff]  ;;  %v61_v6 = vld [vmem:[#allocation2 + $0x68] sm:$0xff] }
  0x10   :  { %37 = vperm.xlu0 %1101, %v30_v1   ;;  %v1185_v4 = vand.u32 4294901760, %v63_v3  ;;  %v60_v7 = vld [vmem:[#allocation2 + $0x60] sm:$0xff]  ;;  %v1187_v8 = vand.u32 4294901760, %v62_v5  ;;  %v1189_v9 = vand.u32 4294901760, %v61_v6  ;;  %v59_v11 = vld [vmem:[#allocation2 + $0x58] sm:$0xff]  ;;  %v58_v12 = vld [vmem:[#allocation2 + $0x50] sm:$0xff] }
  0x11   :  { %v1191_v10 = vand.u32 4294901760, %v60_v7  ;;  %v57_v13 = vld [vmem:[#allocation2 + $0x48] sm:$0xff]  ;;  %v1196_v15 = vand.u32 4294901760, %v59_v11  ;;  %v1199_v16 = vand.u32 4294901760, %v58_v12  ;;  %v56_v18 = vld [vmem:[#allocation2 + $0x40] sm:$0xff]  ;;  %v55_v35 = vld [vmem:[#allocation2 + $0x38] sm:$0xff] }
  0x12   :  { %v1194_v14 = vsub.f32 %v63_v3, %v1185_v4  ;;  %884 = vmatprep.subr.mxu0 %v1185_v4  ;;  %v1201_v17 = vand.u32 4294901760, %v57_v13  ;;  %v1204_v19 = vsub.f32 %v62_v5, %v1187_v8  ;;  %v1207_v20 = vsub.f32 %v61_v6, %v1189_v9  ;;  %v54_v39 = vld [vmem:[#allocation2 + $0x30] sm:$0xff]  ;;  %v53_v40 = vld [vmem:[#allocation2 + $0x28] sm:$0xff]  ;;  %v52_v43 = vld [vmem:[#allocation2 + $0x20] sm:$0xff] }
  0x13   :  { %v1210_v21 = vsub.f32 %v60_v7, %v1191_v10  ;;  %885 = vmatpush3.msra.mxu0 %v1185_v4  ;;  %v1213_v22 = vand.u32 4294901760, %v56_v18  ;;  %v1219_v24 = vsub.f32 %v59_v11, %v1196_v15  ;;  %v1222_v25 = vsub.f32 %v58_v12, %v1199_v16  ;;  %v51_v50 = vld [vmem:[#allocation2 + $0x18] sm:$0xff]  ;;  %v50_v57 = vld [vmem:[#allocation2 + $0x10] sm:$0xff]  ;;  %v49_v63 = vld [vmem:[#allocation2 + $0x8] sm:$0xff] }
  0x14   :  { %40 = vperm.xlu0 %1101, %v31_v2   ;;  %v1216_v23 = vand.u32 4294901760, %v1194_v14  ;;  %886 = vmatprep.subr.mxu0 %v1187_v8  ;;  %v1226_v26 = vand.u32 4294901760, %v1204_v19  ;;  %v1229_v27 = vand.u32 4294901760, %v1207_v20  ;;  %v1236_v29 = vsub.f32 %v57_v13, %v1201_v17  ;;  %v48_v6 = vld [vmem:[#allocation2] sm:$0xff] }
  0x15   :  { %v1232_v28 = vand.u32 4294901760, %v1210_v21  ;;  %887 = vmatpush3.msra.mxu0 %v1187_v8  ;;  %v1241_v31 = vand.u32 4294901760, %v1219_v24  ;;  %v1250_v34 = vsub.f32 %v56_v18, %v1213_v22  ;;  %v1255_v38 = vand.u32 4294901760, %v1222_v25 }
  0x16   :  { %v169_v30 = vsub.f32 %v1194_v14, %v1216_v23  ;;  %888 = vmatprep.subr.mxu0 %v1189_v9  ;;  %v176_v32 = vsub.f32 %v1204_v19, %v1226_v26  ;;  %v183_v33 = vsub.f32 %v1207_v20, %v1229_v27  ;;  %v1259_v42 = vand.u32 4294901760, %v1236_v29 }
  0x17   :  { %889 = vmatpush3.msra.mxu0 %v1189_v9  ;;  %v190_v37 = vsub.f32 %v1210_v21, %v1232_v28  ;;  %v197_v45 = vsub.f32 %v1219_v24, %v1241_v31  ;;  %v1264_v46 = vand.u32 4294901760, %v55_v35  ;;  %v1268_v47 = vand.u32 4294901760, %v1250_v34 }
  0x18   :  { %v170_v36 = vand.u32 4294901760, %v169_v30  ;;  %890 = vmatprep.subr.mxu0 %v1191_v10  ;;  %v177_v41 = vand.u32 4294901760, %v176_v32  ;;  %v184_v44 = vand.u32 4294901760, %v183_v33  ;;  %v1271_v48 = vand.u32 4294901760, %v54_v39 }
  0x19   :  { %891 = vmatpush3.msra.mxu0 %v1191_v10  ;;  %v1273_v49 = vand.u32 4294901760, %v53_v40  ;;  %v191_v51 = vand.u32 4294901760, %v190_v37  ;;  %v204_v52 = vsub.f32 %v1222_v25, %v1255_v38  ;;  %v1278_v53 = vsub.f32 %v55_v35, %v1264_v46 }
  0x1a   :  { %919 = vmatprep.subr.mxu1 %v170_v36  ;;  %892 = vmatprep.subr.mxu0 %v1196_v15  ;;  %v1281_v54 = vand.u32 4294901760, %v52_v43  ;;  %v211_v55 = vsub.f32 %v1236_v29, %v1259_v42  ;;  %v1286_v56 = vsub.f32 %v54_v39, %v1271_v48  ;;  %v198_v58 = vand.u32 4294901760, %v197_v45 }
  0x1b   :  { %920 = vmatpush3.msra.mxu1 %v170_v36  ;;  %893 = vmatpush3.msra.mxu0 %v1196_v15  ;;  %v1290_v59 = vand.u32 4294901760, %v1278_v53  ;;  %v1293_v60 = vsub.f32 %v53_v40, %v1273_v49  ;;  %v1296_v61 = vand.u32 4294901760, %v51_v50  ;;  %v218_v62 = vsub.f32 %v1250_v34, %v1268_v47 }
  0x1c   :  { %921 = vmatprep.subr.mxu1 %v177_v41  ;;  %894 = vmatprep.subr.mxu0 %v1199_v16  ;;  %v205_v0 = vand.u32 4294901760, %v204_v52  ;;  %v1302_v1 = vand.u32 4294901760, %v1286_v56  ;;  %v1305_v2 = vsub.f32 %v52_v43, %v1281_v54  ;;  %v1308_v3 = vand.u32 4294901760, %v50_v57 }
  0x1d   :  { %922 = vmatpush3.msra.mxu1 %v177_v41  ;;  %895 = vmatpush3.msra.mxu0 %v1199_v16  ;;  %v212_v5 = vand.u32 4294901760, %v211_v55  ;;  %v225_v7 = vsub.f32 %v1278_v53, %v1290_v59  ;;  %v1314_v11 = vand.u32 4294901760, %v1293_v60  ;;  %v1317_v12 = vsub.f32 %v51_v50, %v1296_v61 }
  0x1e   :  { %923 = vmatprep.subr.mxu1 %v184_v44  ;;  %896 = vmatprep.subr.mxu0 %v1201_v17  ;;  %v1320_v13 = vand.u32 4294901760, %v49_v63  ;;  %v219_v18 = vand.u32 4294901760, %v218_v62  ;;  %v232_v30 = vsub.f32 %v1286_v56, %v1302_v1  ;;  %v1326_v32 = vand.u32 4294901760, %v1305_v2 }
  0x1f   :  { %924 = vmatpush3.msra.mxu1 %v184_v44  ;;  %897 = vmatpush3.msra.mxu0 %v1201_v17  ;;  %v1329_v33 = vsub.f32 %v50_v57, %v1308_v3  ;;  %v1332_v35 = vand.u32 4294901760, %v48_v6  ;;  %v226_v36 = vand.u32 4294901760, %v225_v7  ;;  %v239_v37 = vsub.f32 %v1293_v60, %v1314_v11 }
  0x20   :  { %925 = vmatprep.subr.mxu1 %v191_v51  ;;  %898 = vmatprep.subr.mxu0 %v1213_v22  ;;  %v1338_v39 = vand.u32 4294901760, %v1317_v12  ;;  %v1341_v40 = vsub.f32 %v49_v63, %v1320_v13  ;;  %v233_v41 = vand.u32 4294901760, %v232_v30  ;;  %v246_v43 = vsub.f32 %v1305_v2, %v1326_v32 }
  0x21   :  { %926 = vmatpush3.msra.mxu1 %v191_v51  ;;  %899 = vmatpush3.msra.mxu0 %v1213_v22  ;;  %v1348_v44 = vand.u32 4294901760, %v1329_v33  ;;  %v1351_v45 = vsub.f32 %v48_v6, %v1332_v35  ;;  %v240_v50 = vand.u32 4294901760, %v239_v37 }
  0x22   :  { %927 = vmatprep.subr.mxu1 %v198_v58  ;;  %900 = vmatprep.subr.mxu0 %v1264_v46  ;;  %v253_v51 = vsub.f32 %v1317_v12, %v1338_v39  ;;  %v1358_v52 = vand.u32 4294901760, %v1341_v40  ;;  %v247_v55 = vand.u32 4294901760, %v246_v43 }
  0x23   :  { %928 = vmatpush3.msra.mxu1 %v198_v58  ;;  %901 = vmatpush3.msra.mxu0 %v1264_v46  ;;  %v260_v57 = vsub.f32 %v1329_v33, %v1348_v44  ;;  %v1365_v58 = vand.u32 4294901760, %v1351_v45 }
  0x24   :  { %929 = vmatprep.subr.mxu1 %v205_v0  ;;  %902 = vmatprep.subr.mxu0 %v1271_v48  ;;  %v254_v62 = vand.u32 4294901760, %v253_v51  ;;  %v267_v63 = vsub.f32 %v1341_v40, %v1358_v52 }
  0x25   :  { %930 = vmatpush3.msra.mxu1 %v205_v0  ;;  %903 = vmatpush3.msra.mxu0 %v1271_v48  ;;  %v261_v0 = vand.u32 4294901760, %v260_v57 }
  0x26   :  { %931 = vmatprep.subr.mxu1 %v212_v5  ;;  %904 = vmatprep.subr.mxu0 %v1273_v49  ;;  %v268_v6 = vand.u32 4294901760, %v267_v63 }
  0x27   :  { %932 = vmatpush3.msra.mxu1 %v212_v5  ;;  %905 = vmatpush3.msra.mxu0 %v1273_v49  ;;  %v274_v5 = vsub.f32 %v1351_v45, %v1365_v58 }
  0x28   :  { %933 = vmatprep.subr.mxu1 %v219_v18  ;;  %906 = vmatprep.subr.mxu0 %v1281_v54 }
  0x29   :  { %934 = vmatpush3.msra.mxu1 %v219_v18  ;;  %907 = vmatpush3.msra.mxu0 %v1281_v54  ;;  %v275_v7 = vand.u32 4294901760, %v274_v5  ;;  %v1382_v18 = vld [vmem:[%s1560_s1] ss:$0 sm:$0xff]  ;;  %s1152_s1 = smov [#allocation5]  }
  0x2a   :  { %935 = vmatprep.subr.mxu1 %v226_v36  ;;  %908 = vmatprep.subr.mxu0 %v1296_v61  ;;  %s755_s23 = sshll.u32 %s1152_s1, 4  ;;  %s756_s23 = int_to_ptr.vmem [resolvable:$true] %s755_s23 }
  0x2b   :  { %936 = vmatpush3.msra.mxu1 %v226_v36  ;;  %909 = vmatpush3.msra.mxu0 %v1296_v61  ;;  %v1150_v36 = vmov 0.0   ;;  %s1122_s24 = scalar_lea.vmem %s756_s23, 256  ;;  %p1127_p6 = scmp.lt.s32.totalorder %s756_s23, %s756_s23 }
  0x2c   :  { %937 = vmatprep.subr.mxu1 %v233_v41  ;;  %910 = vmatprep.subr.mxu0 %v1308_v3  ;;  %p1123_p5 = scmp.ne.s32.totalorder %s756_s23, %s1122_s24  ;;  %p1128_p7 = scmp.lt.s32.totalorder %s1122_s24, %s1122_s24 }
  0x2d   :  { %938 = vmatpush3.msra.mxu1 %v233_v41  ;;  %911 = vmatpush3.msra.mxu0 %v1308_v3  ;;  %v1151_v41 = vmov 1.0  }
  0x2e   :  { %939 = vmatprep.subr.mxu1 %v240_v50  ;;  %912 = vmatprep.subr.mxu0 %v1320_v13  ;;  %p1129_p8 = por %p1128_p7, %p1127_p6 }
  0x2f   :  { %940 = vmatpush3.msra.mxu1 %v240_v50  ;;  %913 = vmatpush3.msra.mxu0 %v1320_v13 }
  0x30   :  { %941 = vmatprep.subr.mxu1 %v247_v55  ;;  %914 = vmatprep.subr.mxu0 %v1332_v35  ;;  %p1130_p9 = pnand %p1129_p8, %p1123_p5 }
  0x31   :  { %942 = vmatpush3.msra.mxu1 %v247_v55  ;;  %915 = vmatpush3.msra.mxu0 %v1332_v35 }
  0x32   :  { %943 = vmatprep.subr.mxu1 %v254_v62  ;;  %954 = vmatprep.subr.mxu0 %v1194_v14 }
  0x33   :  { %944 = vmatpush3.msra.mxu1 %v254_v62 }
  0x34   :  { %945 = vmatprep.subr.mxu1 %v261_v0 }
  0x35   :  { %946 = vmatpush3.msra.mxu1 %v261_v0 }
  0x36   :  { %947 = vmatprep.subr.mxu1 %v268_v6 }
  0x37   :  { %948 = vmatpush3.msra.mxu1 %v268_v6 }
  0x38   :  { %949 = vmatprep.subr.mxu1 %v275_v7 }
  0x39   :  { %950 = vmatpush3.msra.mxu1 %v275_v7 }
  0x3a   :  { %989 = vmatprep.subr.mxu1 %v1185_v4 }
  0x8b   :  { %v1384_v30 = vpop.permute.xlu0 %37 }
  0x8c   :  { %vm42_vm0 = vcmp.eq.s32.totalorder %v1382_v18, %v1384_v30 }
  0x8d   :  { %v768_v37 = vsel %vm42_vm0, 1.0, %v1150_v36  ;;  %951 = vmatprep.mubr.msk.f32.mxu1 %vm42_vm0, %v1151_v41 }
  0x8e   :  { %v146_v43 = vsub.f32 %v768_v37, %v768_v37 }
  0x8f   :  { %v1395_v50 = vpop.permute.xlu0 %40 }
  0x90   :  { %vm43_vm1 = vcmp.eq.s32.totalorder %v1382_v18, %v1395_v50  ;;  %v147_v51 = vand.u32 4294901760, %v146_v43 }
  0x91   :  { %v769_v55 = vsel %vm43_vm1, 1.0, %v1150_v36  ;;  %952 = vmatmul.mubr.msk.f32.vlgmr.msra.gmra.mxu1 %vm43_vm1, %v1151_v41 }
  0x92   :  { %v1406_v57 = vsub.f32 %v769_v55, %v769_v55  ;;  %990 = vmatpush3.msra.mxu1 %v1185_v4  ;;  %1021 = vmatprep.mubr.f32.mxu1 %v147_v51  ;;  %v148_v62 = vsub.f32 %v146_v43, %v147_v51 }
  0x93   :  { %991 = vmatprep.subr.mxu1 %v1187_v8 }
  0x94   :  { %992 = vmatpush3.msra.mxu1 %v1187_v8  ;;  %v149_v63 = vand.u32 4294901760, %v148_v62  ;;  %v157_v0 = vand.u32 4294901760, %v1406_v57 }
  0x95   :  { %993 = vmatprep.subr.mxu1 %v1189_v9 }
  0x96   :  { %994 = vmatpush3.msra.mxu1 %v1189_v9  ;;  %916 = vmatprep.mubr.f32.mxu0 %v149_v63  ;;  %v158_v5 = vsub.f32 %v1406_v57, %v157_v0 }
  0x97   :  { %995 = vmatprep.subr.mxu1 %v1191_v10 }
  0x98   :  { %996 = vmatpush3.msra.mxu1 %v1191_v10  ;;  %v159_v6 = vand.u32 4294901760, %v158_v5 }
  0x99   :  { %997 = vmatprep.subr.mxu1 %v1196_v15 }
  0x9a   :  { %998 = vmatpush3.msra.mxu1 %v1196_v15  ;;  %917 = vmatmul.mubr.f32.vlgmr.msra.gmra.mxu0 %v159_v6 }
  0x9b   :  { %955 = vmatpush3.msra.mxu0 %v1194_v14  ;;  %999 = vmatprep.subr.mxu1 %v1199_v16 }
  0x9c   :  { %956 = vmatprep.subr.mxu0 %v1204_v19  ;;  %986 = vmatprep.mubr.f32.mxu0 %v146_v43 }
  0x9d   :  { %1000 = vmatpush3.msra.mxu1 %v1199_v16  ;;  %957 = vmatpush3.msra.mxu0 %v1204_v19 }
  0x9e   :  { %1001 = vmatprep.subr.mxu1 %v1201_v17  ;;  %958 = vmatprep.subr.mxu0 %v1207_v20 }
  0x9f   :  { %1002 = vmatpush3.msra.mxu1 %v1201_v17  ;;  %959 = vmatpush3.msra.mxu0 %v1207_v20 }
  0xa0   :  { %1003 = vmatprep.subr.mxu1 %v1213_v22  ;;  %960 = vmatprep.subr.mxu0 %v1210_v21 }
  0xa1   :  { %1004 = vmatpush3.msra.mxu1 %v1213_v22  ;;  %961 = vmatpush3.msra.mxu0 %v1210_v21 }
  0xa2   :  { %1005 = vmatprep.subr.mxu1 %v1264_v46  ;;  %962 = vmatprep.subr.mxu0 %v1219_v24 }
  0xa3   :  { %1006 = vmatpush3.msra.mxu1 %v1264_v46  ;;  %963 = vmatpush3.msra.mxu0 %v1219_v24 }
  0xa4   :  { %1007 = vmatprep.subr.mxu1 %v1271_v48  ;;  %964 = vmatprep.subr.mxu0 %v1222_v25 }
  0xa5   :  { %1008 = vmatpush3.msra.mxu1 %v1271_v48  ;;  %965 = vmatpush3.msra.mxu0 %v1222_v25 }
  0xa6   :  { %1009 = vmatprep.subr.mxu1 %v1273_v49  ;;  %966 = vmatprep.subr.mxu0 %v1236_v29 }
  0xa7   :  { %1010 = vmatpush3.msra.mxu1 %v1273_v49  ;;  %967 = vmatpush3.msra.mxu0 %v1236_v29 }
  0xa8   :  { %1011 = vmatprep.subr.mxu1 %v1281_v54  ;;  %968 = vmatprep.subr.mxu0 %v1250_v34 }
  0xa9   :  { %1012 = vmatpush3.msra.mxu1 %v1281_v54  ;;  %969 = vmatpush3.msra.mxu0 %v1250_v34 }
  0xaa   :  { %1013 = vmatprep.subr.mxu1 %v1296_v61  ;;  %970 = vmatprep.subr.mxu0 %v1278_v53 }
  0xab   :  { %1014 = vmatpush3.msra.mxu1 %v1296_v61  ;;  %971 = vmatpush3.msra.mxu0 %v1278_v53 }
  0xac   :  { %1015 = vmatprep.subr.mxu1 %v1308_v3  ;;  %972 = vmatprep.subr.mxu0 %v1286_v56 }
  0xad   :  { %1016 = vmatpush3.msra.mxu1 %v1308_v3  ;;  %973 = vmatpush3.msra.mxu0 %v1286_v56 }
  0xae   :  { %1017 = vmatprep.subr.mxu1 %v1320_v13  ;;  %974 = vmatprep.subr.mxu0 %v1293_v60 }
  0xaf   :  { %1018 = vmatpush3.msra.mxu1 %v1320_v13  ;;  %975 = vmatpush3.msra.mxu0 %v1293_v60 }
  0xb0   :  { %1019 = vmatprep.subr.mxu1 %v1332_v35  ;;  %976 = vmatprep.subr.mxu0 %v1305_v2 }
  0xb1   :  { %1020 = vmatpush3.msra.mxu1 %v1332_v35  ;;  %977 = vmatpush3.msra.mxu0 %v1305_v2 }
  0xb2   :  { %1022 = vmatmul.mubr.f32.vlgmr.msra.gmra.mxu1 %v157_v0  ;;  %1059 = vmatprep.subr.mxu1 %v1185_v4 }
  0xb3   :  { %978 = vmatprep.subr.mxu0 %v1317_v12  ;;  %1060 = vmatpush3.msra.mxu1 %v1185_v4 }
  0xb4   :  { %1091 = vmatprep.mubr.msk.f32.mxu1 %vm42_vm0, %v1151_v41  ;;  %979 = vmatpush3.msra.mxu0 %v1317_v12 }
  0xb5   :  { %1061 = vmatprep.subr.mxu1 %v1187_v8  ;;  %980 = vmatprep.subr.mxu0 %v1329_v33 }
  0xb6   :  { %1062 = vmatpush3.msra.mxu1 %v1187_v8  ;;  %981 = vmatpush3.msra.mxu0 %v1329_v33 }
  0xb7   :  { %1063 = vmatprep.subr.mxu1 %v1189_v9  ;;  %982 = vmatprep.subr.mxu0 %v1341_v40 }
  0xb8   :  { %1064 = vmatpush3.msra.mxu1 %v1189_v9  ;;  %983 = vmatpush3.msra.mxu0 %v1341_v40 }
  0xb9   :  { %1065 = vmatprep.subr.mxu1 %v1191_v10  ;;  %984 = vmatprep.subr.mxu0 %v1351_v45 }
  0xba   :  { %1066 = vmatpush3.msra.mxu1 %v1191_v10  ;;  %985 = vmatpush3.msra.mxu0 %v1351_v45 }
  0xbb   :  { %1067 = vmatprep.subr.mxu1 %v1196_v15  ;;  %987 = vmatmul.mubr.f32.vlgmr.msra.gmra.mxu0 %v1406_v57 }
  0xbc   :  { %1024 = vmatprep.subr.mxu0 %v1216_v23  ;;  %1068 = vmatpush3.msra.mxu1 %v1196_v15 }
  0xbd   :  { %1025 = vmatpush3.msra.mxu0 %v1216_v23  ;;  %1056 = vmatprep.mubr.msk.f32.mxu0 %vm42_vm0, %v1151_v41 }
  0xbe   :  { %1069 = vmatprep.subr.mxu1 %v1199_v16  ;;  %1026 = vmatprep.subr.mxu0 %v1226_v26 }
  0xbf   :  { %1070 = vmatpush3.msra.mxu1 %v1199_v16  ;;  %1027 = vmatpush3.msra.mxu0 %v1226_v26 }
  0xc0   :  { %1071 = vmatprep.subr.mxu1 %v1201_v17  ;;  %1028 = vmatprep.subr.mxu0 %v1229_v27 }
  0xc1   :  { %1072 = vmatpush3.msra.mxu1 %v1201_v17  ;;  %1029 = vmatpush3.msra.mxu0 %v1229_v27 }
  0xc2   :  { %1073 = vmatprep.subr.mxu1 %v1213_v22  ;;  %1030 = vmatprep.subr.mxu0 %v1232_v28 }
  0xc3   :  { %1074 = vmatpush3.msra.mxu1 %v1213_v22  ;;  %1031 = vmatpush3.msra.mxu0 %v1232_v28 }
  0xc4   :  { %1075 = vmatprep.subr.mxu1 %v1264_v46  ;;  %1032 = vmatprep.subr.mxu0 %v1241_v31 }
  0xc5   :  { %1076 = vmatpush3.msra.mxu1 %v1264_v46  ;;  %1033 = vmatpush3.msra.mxu0 %v1241_v31 }
  0xc6   :  { %1077 = vmatprep.subr.mxu1 %v1271_v48  ;;  %1034 = vmatprep.subr.mxu0 %v1255_v38 }
  0xc7   :  { %1078 = vmatpush3.msra.mxu1 %v1271_v48  ;;  %1035 = vmatpush3.msra.mxu0 %v1255_v38 }
  0xc8   :  { %1079 = vmatprep.subr.mxu1 %v1273_v49  ;;  %1036 = vmatprep.subr.mxu0 %v1259_v42 }
  0xc9   :  { %1080 = vmatpush3.msra.mxu1 %v1273_v49  ;;  %1037 = vmatpush3.msra.mxu0 %v1259_v42 }
  0xca   :  { %1081 = vmatprep.subr.mxu1 %v1281_v54  ;;  %1038 = vmatprep.subr.mxu0 %v1268_v47 }
  0xcb   :  { %1082 = vmatpush3.msra.mxu1 %v1281_v54  ;;  %1039 = vmatpush3.msra.mxu0 %v1268_v47 }
  0xcc   :  { %1083 = vmatprep.subr.mxu1 %v1296_v61  ;;  %1040 = vmatprep.subr.mxu0 %v1290_v59 }
  0xcd   :  { %1084 = vmatpush3.msra.mxu1 %v1296_v61  ;;  %1041 = vmatpush3.msra.mxu0 %v1290_v59 }
  0xce   :  { %1085 = vmatprep.subr.mxu1 %v1308_v3  ;;  %1042 = vmatprep.subr.mxu0 %v1302_v1 }
  0xcf   :  { %1086 = vmatpush3.msra.mxu1 %v1308_v3  ;;  %1043 = vmatpush3.msra.mxu0 %v1302_v1 }
  0xd0   :  { %1087 = vmatprep.subr.mxu1 %v1320_v13  ;;  %1044 = vmatprep.subr.mxu0 %v1314_v11 }
  0xd1   :  { %1088 = vmatpush3.msra.mxu1 %v1320_v13  ;;  %1045 = vmatpush3.msra.mxu0 %v1314_v11 }
  0xd2   :  { %1089 = vmatprep.subr.mxu1 %v1332_v35  ;;  %1046 = vmatprep.subr.mxu0 %v1326_v32 }
  0xd3   :  { %1090 = vmatpush3.msra.mxu1 %v1332_v35  ;;  %1047 = vmatpush3.msra.mxu0 %v1326_v32 }
  0xd4   :  { %1092 = vmatmul.mubr.msk.f32.vlgmr.msra.gmra.mxu1 %vm43_vm1, %v1151_v41  ;;  %1048 = vmatprep.subr.mxu0 %v1338_v39 }
  0xd5   :  { %1049 = vmatpush3.msra.mxu0 %v1338_v39 }
  0xd6   :  { %1050 = vmatprep.subr.mxu0 %v1348_v44 }
  0xd7   :  { %1051 = vmatpush3.msra.mxu0 %v1348_v44 }
  0xd8   :  { %1052 = vmatprep.subr.mxu0 %v1358_v52 }
  0xd9   :  { %1053 = vmatpush3.msra.mxu0 %v1358_v52 }
  0xda   :  { %1054 = vmatprep.subr.mxu0 %v1365_v58 }
  0xdb   :  { %1055 = vmatpush3.msra.mxu0 %v1365_v58 }
  0xdc   :  { %1057 = vmatmul.mubr.msk.f32.vlgmr.msra.gmra.mxu0 %vm43_vm1, %v1151_v41 }
 0x151   :  { %v953_v8 = vpop.f32.mrf.mxu1 }
 0x153   :  { %v312_v14 = vpop.f32.mrf.mxu1 }
 0x15a   :  { %v918_v4 = vpop.f32.mrf.mxu0 }
 0x15b   :  { %v319_v15 = vadd.f32 %v953_v8, %v918_v4 }
 0x15c   :  { %v151_v9 = vpop.f32.mrf.mxu0 }
 0x15d   :  { %v313_v19 = vadd.f32 %v312_v14, %v151_v9 }
 0x172   :  { %v1023_v16 = vpop.f32.mrf.mxu1 }
 0x174   :  { %v518_v22 = vpop.f32.mrf.mxu1 }
 0x17b   :  { %v988_v10 = vpop.f32.mrf.mxu0 }
 0x17c   :  { %v430_v20 = vadd.f32 %v988_v10, %v319_v15 }
 0x17d   :  { %v422_v17 = vpop.f32.mrf.mxu0 }
 0x17e   :  { %v423_v21 = vadd.f32 %v422_v17, %v313_v19  ;;  %v527_v23 = vadd.f32 %v1023_v16, %v430_v20 }
 0x180   :  { %v519_v27 = vadd.f32 %v518_v22, %v423_v21 }
 0x194   :  { %v1093_v24 = vpop.f32.mrf.mxu1 }
 0x196   :  { %v738_v34 = vpop.f32.mrf.mxu1 }
 0x19c   :  { %v1058_v25 = vpop.f32.mrf.mxu0 }
 0x19d   :  { %v652_v26 = vadd.f32 %v1058_v25, %v527_v23 }
 0x19e   :  { %v645_v28 = vpop.f32.mrf.mxu0 }
 0x19f   :  { %v745_v29 = vadd.f32 %v1093_v24, %v652_v26  ;;  %v646_v31 = vadd.f32 %v645_v28, %v519_v27 }
 0x1a1   :  { %749 = vst [vmem:[#allocation5 + $0x8] sm:$0xff] %v745_v29  ;;  %v739_v38 = vadd.f32 %v738_v34, %v646_v31 }
 0x1a3   :  { %748 = vst [vmem:[#allocation5] sm:$0xff] %v739_v38 }
 0x1a4   :  { %1133 = shalt.err (!%p1130_p9)
}
 0x1a5   :  { %761 = dma.vmem_to_hbm [thread:$0]  %s756_s23, 256, %s1562_s3, [#allocation4], %s1147_s15, %s1147_s15, %s1148_s16  }
 0x1a6   :  { %1144 = dma.done.wait [#allocation4], 256  }
 0x1a7   :  { %1145 = vsyncadd [#allocation4], 4294967040 }
 0x1a8   :  { %765 = vsyncpa [#allocation3], 1 }
 0x1a9   :  { %766 = vsyncpa [#allocation4], 1 }

</bundles_post_ra>
